<compile_context>
chip_gen: v6e
topology: v6e:2x2x1
jax: 0.10.0
libtpu: 0.0.40
codegen_flags: <defaults>
</compile_context>

<pallas_src>
import jax
import jax.numpy as jnp
import numpy as np
from jax.experimental import pallas as pl
from jax.experimental.pallas import tpu as pltpu


# ----------------------------- Pallas kernel ------------------------------ #

def _monarch_kernel(x_ref, m_ref, o_ref):
    # x_ref: (TB, N) in x.dtype, m_ref: (N, N) bf16 folded weight, o_ref: (TB, N)
    xb = x_ref[...].astype(jnp.bfloat16)            # in-kernel cast: VPU, free filler
    y = jnp.dot(xb, m_ref[...], preferred_element_type=jnp.float32)
    o_ref[...] = y.astype(o_ref.dtype)


# ------------------------------ glue / setup ------------------------------ #

def _round_up(x, m):
    return ((x + m - 1) // m) * m


def _perm_matrix(sqrt_n):
    """Matrix P so that (x @ P) realizes rearrange '(m n) -> (n m)', n=sqrt_n."""
    n = sqrt_n * sqrt_n
    idx = jnp.arange(n)
    src = (idx % sqrt_n) * sqrt_n + (idx // sqrt_n)          # out[j] = in[src[j]]
    return jax.nn.one_hot(src, n, dtype=jnp.float32).T       # P[i, j] = 1 iff i == src[j]


def _block_diag_T(w):
    """w: (s, s, s) with w[b, n, m]. Returns W so (x @ W)[b*s+n] = sum_m x[b*s+m]*w[b,n,m]."""
    return jax.scipy.linalg.block_diag(*w).T.astype(jnp.float32)


def _choose_block_b(b_total, max_block=1024):
    """Rows per grid step.

    Large tiles amortize the ~0.35 us/step overhead; cap so there are >= 2 grid
    blocks when the batch allows (both v7x TensorCores get work); keep the block
    a multiple of 8 sublanes (or the full batch when it is smaller than that).
    """
    if b_total <= max_block:
        half = -(-b_total // 2)                # cdiv(b_total, 2)
        bb = _round_up(half, 8)
        return bb if bb < b_total else b_total
    return max_block


def monarch_matrix(x, L, R, *, block_b=None, out_dtype=None):
    """Forward pass of MonarchMatrix(L, R) applied to x of shape (..., sqrt_n**2)."""
    sqrt_n = L.shape[0]
    n = sqrt_n * sqrt_n
    lead = x.shape[:-1]
    xf = x.reshape(-1, n)
    b_total = xf.shape[0]
    out_dtype = x.dtype if out_dtype is None else out_dtype

    # Fold the whole operator into one dense weight (exact in f32; one bf16 rounding):
    #   y = x @ P @ BD(L)^T @ P @ BD(R)^T @ P = x @ M
    perm = _perm_matrix(sqrt_n)
    wl = _block_diag_T(L)
    wr = _block_diag_T(R)
    m = (perm @ wl @ perm @ wr @ perm).astype(jnp.bfloat16)

    if block_b is None:
        block_b = _choose_block_b(b_total)
    num_blocks = pl.cdiv(b_total, block_b)

    # Estimated VMEM footprint (double-buffered x/out tiles + double-buffered weight);
    # raise the scoped-VMEM limit only when the default (16 MiB on v5e) would clip it.
    vmem_need = (2 * block_b * n * x.dtype.itemsize
                 + 2 * block_b * n * jnp.dtype(out_dtype).itemsize
                 + 2 * n * n * 2)
    cp_kwargs = dict(dimension_semantics=("parallel",))
    if vmem_need > (12 << 20):
        cp_kwargs["vmem_limit_bytes"] = min(int(vmem_need * 2), 48 << 20)

    out = pl.pallas_call(
        _monarch_kernel,
        out_shape=jax.ShapeDtypeStruct((b_total, n), out_dtype),
        grid=(num_blocks,),
        in_specs=[
            pl.BlockSpec((block_b, n), lambda i: (i, 0)),    # x tile (partial last block OK)
            pl.BlockSpec((n, n), lambda i: (0, 0)),          # M = P @ BD(L)^T @ P @ BD(R)^T @ P
        ],
        out_specs=pl.BlockSpec((block_b, n), lambda i: (i, 0)),
        compiler_params=pltpu.CompilerParams(**cp_kwargs),
    )(xf, m)

    return out.reshape(*lead, n)


# --------------------------- pure-JAX reference ---------------------------- #

def _blockdiag_matmul_ref(x, w):
    b, _, mm = w.shape
    xr = x.reshape(x.shape[:-1] + (b, mm))
    out = jnp.einsum('bnm,...bm->...bn', w, xr)
    return out.reshape(x.shape)


def _rearrange_mn_to_nm(x, sqrt_n):
    mm = x.shape[-1] // sqrt_n
    xr = x.reshape(x.shape[:-1] + (mm, sqrt_n))
    xr = jnp.swapaxes(xr, -1, -2)
    return xr.reshape(x.shape)


def monarch_ref(x, L, R):
    s = L.shape[0]
    x = _rearrange_mn_to_nm(x, s)
    x = _blockdiag_matmul_ref(x, L)
    x = _rearrange_mn_to_nm(x, s)
    x = _blockdiag_matmul_ref(x, R)
    x = _rearrange_mn_to_nm(x, s)
    return x


# ----------------------------------- main ---------------------------------- #

if __name__ == "__main__":
    sqrt_n = 16
    n = sqrt_n * sqrt_n          # feature dim = 256
    batch, seq = 2, 8            # leading '...' dims -> 16 rows total

    key = jax.random.PRNGKey(0)
    kx, kl, kr = jax.random.split(key, 3)
    x = jax.random.normal(kx, (batch, seq, n), dtype=jnp.float32)
    # deterministic parameter init; shapes match nn.Parameter L/R of (sqrt_n, sqrt_n, sqrt_n)
    L = jax.random.normal(kl, (sqrt_n, sqrt_n, sqrt_n), dtype=jnp.float32) / sqrt_n
    R = jax.random.normal(kr, (sqrt_n, sqrt_n, sqrt_n), dtype=jnp.float32) / sqrt_n
    # NOTE: `shrink` flag in __init__ is unused by forward(); nothing to implement for it.

    out = jax.block_until_ready(monarch_matrix(x, L, R))
    ref = monarch_ref(x, L, R)

    assert out.shape == x.shape
    assert out.dtype == x.dtype
    max_diff = float(np.max(np.abs(np.asarray(out, dtype=np.float32)
                                   - np.asarray(ref, dtype=np.float32))))
    assert np.allclose(np.asarray(out, dtype=np.float32),
                       np.asarray(ref, dtype=np.float32),
                       rtol=2e-2, atol=2e-2), max_diff

    print("KERNEL_OK")
</pallas_src>

<mosaic_0001>
module attributes {stable_mosaic.version = 11 : i64} {
  func.func @_monarch_kernel(%arg0: i32, %arg1: memref<8x256xf32, #tpu.memory_space<vmem>>, %arg2: memref<256x256xbf16, #tpu.memory_space<vmem>>, %arg3: memref<8x256xf32, #tpu.memory_space<vmem>>) attributes {dimension_semantics = [#tpu.dimension_semantics<parallel>], iteration_bounds = array<i64: 2>, scalar_prefetch = 0 : i64, scratch_operands = 0 : i64, tpu.core_type = #tpu.core_type<tc>, window_params = [{transform_indices = @transform_0, window_bounds = array<i64: 8, 256>}, {pipeline_mode = #tpu.pipeline_mode<synchronous>, transform_indices = @transform_1, window_bounds = array<i64: 256, 256>}, {transform_indices = @transform_2, window_bounds = array<i64: 8, 256>}]} {
    %c0 = arith.constant 0 : index
    %c0_0 = arith.constant 0 : index
    %0 = vector.load %arg1[%c0, %c0_0] : memref<8x256xf32, #tpu.memory_space<vmem>>, vector<8x256xf32>
    %1 = arith.truncf %0 : vector<8x256xf32> to vector<8x256xbf16>
    %c0_1 = arith.constant 0 : index
    %c0_2 = arith.constant 0 : index
    %2 = vector.load %arg2[%c0_1, %c0_2] : memref<256x256xbf16, #tpu.memory_space<vmem>>, vector<256x256xbf16>
    %cst = arith.constant dense<0.000000e+00> : vector<8x256xf32>
    %3 = tpu.matmul %1, %2, %cst {dimension_numbers = #tpu.dot_dimension_numbers<[1], [0], [0], [1], [0, 0, 1, 1], [], []>} : vector<8x256xbf16>, vector<256x256xbf16>, vector<8x256xf32> -> vector<8x256xf32>
    %c0_3 = arith.constant 0 : index
    %c0_4 = arith.constant 0 : index
    %4 = vector.load %arg3[%c0_3, %c0_4] : memref<8x256xf32, #tpu.memory_space<vmem>>, vector<8x256xf32>
    tpu.vector_store %arg3[%c0_3, %c0_4], %3 {strides = array<i32>} : memref<8x256xf32, #tpu.memory_space<vmem>>, vector<8x256xf32>,
    return
  }
  func.func @transform_0(%arg0: i32) -> (i32, i32) {
    %c0_i32 = arith.constant 0 : i32
    %c0_i32_0 = arith.constant 0 : i32
    return %arg0, %c0_i32 : i32, i32
  }
  func.func @transform_1(%arg0: i32) -> (i32, i32) {
    %c0_i32 = arith.constant 0 : i32
    %c0_i32_0 = arith.constant 0 : i32
    %c0_i32_1 = arith.constant 0 : i32
    return %c0_i32, %c0_i32_0 : i32, i32
  }
  func.func @transform_2(%arg0: i32) -> (i32, i32) {
    %c0_i32 = arith.constant 0 : i32
    %c0_i32_0 = arith.constant 0 : i32
    return %arg0, %c0_i32 : i32, i32
  }
}

</mosaic_0001>

<bundles_post_ra>
// kernel: tpu_custom_call.1
= control target key start
LH: loop header
LB: loop body
LE: loop exit
PB: predicated region body
PF: predicated region fallthrough
CT: control target
= control target key end

     0   :  { %7 = vsyncpa [#allocation3], 0  ;;  %s984_s0 = inlined_call_operand.hbm [shape: f32[16,256], index: 0, kind: input, shape index: {}]   ;;  %s985_s1 = inlined_call_operand.hbm [shape: bf16[256,256], index: 1, kind: input, shape index: {}]   ;;  %s986_s2 = inlined_call_operand.hbm [shape: f32[16,256], index: 2, kind: output, shape index: {}]  }
   0x1   :  { %9 = vsyncpa [#allocation3 + $0x1], 0 }
   0x2   :  { %10 = vsyncpa [#allocation6], 0 }
   0x3   :  { %11 = vsyncpa [#allocation4], 0 }
   0x4   :  { %13 = vsyncpa [#allocation4 + $0x1], 0  ;;  %s810_s9 = smov 0   ;;  %s812_s10 = smov 0  }
   0x5   :  { %s814_s11 = smov 0   ;;  %s816_s12 = smov 0  }
   0x6 LB: > { %s831_s13 = sadd.s32 4294967295, %s788_s12   ;;  %s509_s14 = sadd.s32 4294967294, %s788_s12   ;;  %s788_s12 = sphi %s816_s12, %s1008_s12   ;;  %s784_s11 = sphi %s814_s11, %s1007_s11   ;;  %s780_s10 = sphi %s812_s10, %s1006_s10   ;;  %s776_s9 = sphi %s810_s9, %s1005_s9  }
   0x7   : > { %p39_p0 = scmp.ne.s32.totalorder %s780_s10, %s776_s9  ;;  %p987_p1 = scmp.eq.s32.totalorder %s831_s13, 0 }
   0x8   : > { %p90_p3 = scmp.eq.s32.totalorder %s509_s14, 1  ;;  %p510_p5 = scmp.ge.s32.totalorder %s788_s12, 1 }
   0x9   : > { %p840_p4 = por %p987_p1, %p39_p0  ;;  %p97_p7 = scmp.lt.s32.totalorder %s788_s12, 3 }
   0xa   : > { %p845_p6 = por %p90_p3, %p39_p0  ;;  %s790_s18 = smov [#allocation5]  }
   0xb   : > { %s991_s15 = scalar_select %p840_p4, 1, 0 }
   0xc   : > { %s992_s16 = scalar_select %p845_p6, 1, 0 }
   0xd   : > { %p850_p8 = pnand %p510_p5, %p97_p7  ;;  %s109_s19 = sshll.u32 %s790_s18, 4  ;;  %s110_s19 = int_to_ptr.vmem [resolvable:$true] %s109_s19 }
   0xe   : > { %s864_s21 = sadd.s32 1, %s788_s12   ;;  %s26_s22 = sadd.s32 1, %s784_s11 }
   0xf   : > { %s993_s17 = scalar_select %p850_p8, 1, 0 }
  0x10   : > { %p567_p9 = pneg %p850_p8  ;;  %s23_s23 = ssub.s32 %s788_s12, %s864_s21 }
  0x11   : > { %s677_s24 = scalar_lea.vmem %s110_s19, 4096  ;;  %p685_p5 = scmp.lt.s32.totalorder %s110_s19, %s110_s19 }
  0x12   : > { %p859_p11 = pnand %p567_p9, %p987_p1  ;;  %p678_p13 = scmp.ne.s32.totalorder %s110_s19, %s677_s24 }
  0x13   : > { %p686_p7 = scmp.lt.s32.totalorder %s677_s24, %s677_s24 }
  0x14   : > { %p668_p12 = pneg %p859_p11 }
  0x15   : > { %p687_p10 = por %p686_p7, %p685_p5 }
  0x16   : > { %p680_p0 = pnand %p678_p13, %p668_p12 }
  0x18   : > { %p681_p3 = pneg %p680_p0 }
  0x1a   : > { %p688_p2 = pnand %p687_p10, %p681_p3 }
  0x1c   : > { %691 = shalt.err (!%p688_p2)
}
  0x1d   : > { %s791_s25 = smov 128   ;;  %s792_s26 = smov 8  }
  0x1e   : > { %570 = dma.hbm_to_vmem [thread:$0]  (!%p859_p11), %s985_s1, 4096, %s110_s19, [#allocation6], %s791_s25, %s791_s25, %s792_s26  }
  0x1f   : > { %p24_p9 = scmp.eq.s32.totalorder %s23_s23, 0  ;;  %p33_p12 = scmp.ne.s32.totalorder %s784_s11, %s780_s10 }
  0x20   : > { %p34_p10 = scmp.eq.s32.totalorder %s788_s12, 0  ;;  %p580_p2 = scmp.lt.s32.totalorder %s788_s12, 2 }
  0x21   : > { %s881_s29 = scalar_select %p24_p9, %s784_s11, %s26_s22  }
  0x22   : > { %p35_p13 = por %p34_p10, %p33_p12  ;;  %p995_p0 = scmp.eq.s32.totalorder %s831_s13, 1 }
  0x23   : > { %s123_s3 = sand.u32 1, %s784_s11   ;;  %s557_s4 = sshll.u32 %s788_s12, 8 }
  0x24   : > { %p885_p3 = por %p995_p0, %p33_p12  ;;  %s513_s5 = sshll.u32 %s123_s3, 4 }
  0x25   : > { %s894_s8 = scalar_lea.hbm %s984_s0, %s557_s4  ;;  %s127_s14 = scalar_lea.vmem [#allocation2], %s513_s5 }
  0x26   : > { %s996_s30 = scalar_select %p885_p3, 1, 0 }
  0x27   : > { %s135_s18 = sshll.u32 %s127_s14, 4  ;;  %p896_p11 = pnand %p580_p2, %p35_p13  ;;  %s136_s18 = int_to_ptr.vmem [resolvable:$true] %s135_s18 }
  0x28   : > { %s124_s20 = scalar_lea.sflag [#allocation3], %s123_s3  ;;  %s692_s22 = scalar_lea.hbm %s894_s8, 256 }
  0x29   : > { %p693_p5 = scmp.ne.s32.totalorder %s894_s8, %s692_s22  ;;  %p694_p7 = pneg %p896_p11 }
  0x2a   : > { %s697_s25 = scalar_lea.hbm %s984_s0, 512  ;;  %p698_p10 = scmp.lt.s32.totalorder %s894_s8, %s984_s0 }
  0x2b   : > { %p695_p9 = pnand %p694_p7, %p693_p5  ;;  %p699_p2 = scmp.lt.s32.totalorder %s697_s25, %s692_s22 }
  0x2d   : > { %p696_p12 = pneg %p695_p9  ;;  %p700_p13 = por %p699_p2, %p698_p10 }
  0x2f   : > { %p701_p0 = pnand %p700_p13, %p696_p12 }
  0x31   : > { %704 = shalt.err (!%p701_p0)
}
  0x32   : > { %s705_s28 = scalar_lea.vmem %s136_s18, 256  ;;  %s793_s3 = smov [#allocation2]  }
  0x33   : > { %p706_p1 = scmp.ne.s32.totalorder %s136_s18, %s705_s28  ;;  %s710_s4 = sshll.u32 %s793_s3, 4  ;;  %s711_s4 = int_to_ptr.vmem [resolvable:$false] %s710_s4 }
  0x34   : > { %s712_s5 = scalar_lea.vmem %s711_s4, 512  ;;  %p713_p5 = scmp.lt.s32.totalorder %s136_s18, %s711_s4 }
  0x35   : > { %p708_p6 = pnand %p706_p1, %p694_p7  ;;  %p714_p9 = scmp.lt.s32.totalorder %s712_s5, %s705_s28 }
  0x37   : > { %p709_p3 = pneg %p708_p6  ;;  %p715_p4 = por %p714_p9, %p713_p5 }
  0x39   : > { %p716_p8 = pnand %p715_p4, %p709_p3 }
  0x3b   : > { %719 = shalt.err (!%p716_p8)
}
  0x3c   : > { %574 = dma.hbm_to_vmem [thread:$0]  (!%p896_p11), %s894_s8, 256, %s136_s18, %s124_s20  }
  0x3d   : > { %p998_p12 = scmp.ne.s32.totalorder %s993_s17, 0 }
  0x3e   : > { %s917_s6 = sand.u32 (!%p998_p12), 1, %s780_s10   ;;  %p999_p1 = scmp.ne.s32.totalorder (!%p998_p12), %s991_s15, 0 }
  0x3f   : > { %144 = sbr.rel (%p998_p12) target bundleno = 346 (0x15a), region = 28  ;;  %s517_s7 = sshll.u32 (!%p998_p12), %s917_s6, 4 }
  0x40   : > { %s147_s14 = scalar_lea.sflag (!%p998_p12), [#allocation3], %s917_s6  ;;  %s923_s22 = scalar_lea.vmem (!%p998_p12), [#allocation2], %s517_s7 }
  0x44   : > { %763 = dma.done.wait (%p999_p1), %s147_s14, 256  }
  0x45   : > { %765 = vsyncadd (%p999_p1), %s147_s14, 4294967040  ;;  %p1000_p4 = scmp.eq.s32.totalorder %s831_s13, 0 }
  0x47   : > { %767 = dma.done.wait (%p1000_p4), [#allocation6], 4096   ;;  %p1001_p6 = pmov %p1000_p4 }
  0x48   : > { %v618_v0 = vld [vmem:[#allocation5 + $0x74] ss:$8 sps:$4 sm:$0xff]   ;;  %v620_v1 = vld [vmem:[#allocation5 + $0x70] ss:$8 sps:$4 sm:$0xff]   ;;  %v621_v2 = vld [vmem:[#allocation5 + $0x64] ss:$8 sps:$4 sm:$0xff]  }
  0x49   : > { %769 = vsyncadd (%p1001_p6), [#allocation6], 4294963200  ;;  %371 = vmatprep.subr.bf16.mxu0 %v618_v0  ;;  %v623_v3 = vld [vmem:[#allocation5 + $0x60] ss:$8 sps:$4 sm:$0xff]   ;;  %v624_v4 = vld [vmem:[#allocation5 + $0x54] ss:$8 sps:$4 sm:$0xff]  }
  0x4a   : > { %372 = vmatpush1.bf16.msra.mxu0 %v620_v1  ;;  %v626_v5 = vld [vmem:[#allocation5 + $0x50] ss:$8 sps:$4 sm:$0xff]   ;;  %v627_v6 = vld [vmem:[#allocation5 + $0x44] ss:$8 sps:$4 sm:$0xff]   ;;  %v629_v7 = vld [vmem:[#allocation5 + $0x40] ss:$8 sps:$4 sm:$0xff]  }
  0x4b   : > { %373 = vmatprep.subr.bf16.mxu0 %v621_v2  ;;  %v630_v8 = vld [vmem:[#allocation5 + $0x34] ss:$8 sps:$4 sm:$0xff]   ;;  %v632_v9 = vld [vmem:[#allocation5 + $0x30] ss:$8 sps:$4 sm:$0xff]   ;;  %v633_v10 = vld [vmem:[#allocation5 + $0x24] ss:$8 sps:$4 sm:$0xff]  }
  0x4c   : > { %v635_v11 = vld [vmem:[#allocation5 + $0x20] ss:$8 sps:$4 sm:$0xff]   ;;  %v636_v12 = vld [vmem:[#allocation5 + $0x14] ss:$8 sps:$4 sm:$0xff]   ;;  %v638_v15 = vld [vmem:[#allocation5 + $0x10] ss:$8 sps:$4 sm:$0xff]  }
  0x4d   : > { %v176_v13 = vld [vmem:[%s923_s22 + $0x8] sm:$0xff]  ;;  %v175_v34 = vld [vmem:[%s923_s22] sm:$0xff]  ;;  %s174_s15 = scalar_lea.vmem [#allocation7], %s517_s7  ;;  %s558_s8 = sshll.u32 %s831_s13, 8 }
  0x4e   : > { %374 = vmatpush1.bf16.msra.mxu0 %v623_v3  ;;  %v178_v14 = vpack.c.bf16 %v176_v13, %v176_v13  ;;  %v639_v16 = vld [vmem:[#allocation5 + $0x4] ss:$8 sps:$4 sm:$0xff]   ;;  %v641_v17 = vld [vmem:[#allocation5] ss:$8 sps:$4 sm:$0xff]   ;;  %v642_v18 = vld [vmem:[#allocation5 + $0xf4] ss:$8 sps:$4 sm:$0xff]   ;;  %v177_v35 = vpack.c.bf16 %v175_v34, %v175_v34  ;;  %s943_s20 = scalar_lea.hbm %s986_s2, %s558_s8 }
  0x4f   : > { %375 = vmatprep.subr.bf16.mxu0 %v624_v4  ;;  %v644_v19 = vld [vmem:[#allocation5 + $0xf0] ss:$8 sps:$4 sm:$0xff]   ;;  %v645_v20 = vld [vmem:[#allocation5 + $0xe4] ss:$8 sps:$4 sm:$0xff]   ;;  %v647_v21 = vld [vmem:[#allocation5 + $0xe0] ss:$8 sps:$4 sm:$0xff]  }
  0x50   : > { %403 = vmatprep.mubr.bf16.mxu0 %v178_v14  ;;  %v648_v22 = vld [vmem:[#allocation5 + $0xd4] ss:$8 sps:$4 sm:$0xff]   ;;  %v650_v23 = vld [vmem:[#allocation5 + $0xd0] ss:$8 sps:$4 sm:$0xff]   ;;  %v651_v24 = vld [vmem:[#allocation5 + $0xc4] ss:$8 sps:$4 sm:$0xff]  }
  0x51   : > { %v653_v25 = vld [vmem:[#allocation5 + $0xc0] ss:$8 sps:$4 sm:$0xff]   ;;  %v654_v26 = vld [vmem:[#allocation5 + $0xb4] ss:$8 sps:$4 sm:$0xff]   ;;  %v656_v27 = vld [vmem:[#allocation5 + $0xb0] ss:$8 sps:$4 sm:$0xff]  }
  0x52   : > { %376 = vmatpush1.bf16.msra.mxu0 %v626_v5  ;;  %v657_v28 = vld [vmem:[#allocation5 + $0xa4] ss:$8 sps:$4 sm:$0xff]   ;;  %v659_v29 = vld [vmem:[#allocation5 + $0xa0] ss:$8 sps:$4 sm:$0xff]   ;;  %v660_v30 = vld [vmem:[#allocation5 + $0x94] ss:$8 sps:$4 sm:$0xff]  }
  0x53   : > { %377 = vmatprep.subr.bf16.mxu0 %v627_v6  ;;  %v662_v31 = vld [vmem:[#allocation5 + $0x90] ss:$8 sps:$4 sm:$0xff]   ;;  %v663_v32 = vld [vmem:[#allocation5 + $0x84] ss:$8 sps:$4 sm:$0xff]   ;;  %v665_v33 = vld [vmem:[#allocation5 + $0x80] ss:$8 sps:$4 sm:$0xff]  }
  0x54   : > { %s429_s17 = sshll.u32 %s174_s15, 4  ;;  %s415_s23 = scalar_lea.sflag [#allocation4], %s917_s6  ;;  %s938_s17 = int_to_ptr.vmem [resolvable:$true] %s429_s17 }
  0x55   : > { %s720_s24 = scalar_lea.vmem %s938_s17, 256  ;;  %p1002_p3 = scmp.ne.s32.totalorder %s996_s30, 0 }
  0x56   : > { %378 = vmatpush1.bf16.msra.mxu0 %v629_v7  ;;  %p721_p8 = scmp.ne.s32.totalorder %s938_s17, %s720_s24  ;;  %s794_s13 = smov [#allocation7]  }
  0x57   : > { %379 = vmatprep.subr.bf16.mxu0 %v630_v8  ;;  %s724_s25 = sshll.u32 %s794_s13, 4  ;;  %s725_s25 = int_to_ptr.vmem [resolvable:$false] %s724_s25 }
  0x58   : > { %p722_p11 = pnand %p721_p8, %p1002_p3  ;;  %s726_s26 = scalar_lea.vmem %s725_s25, 512 }
  0x59   : > { %p727_p10 = scmp.lt.s32.totalorder %s938_s17, %s725_s25  ;;  %p728_p2 = scmp.lt.s32.totalorder %s726_s26, %s720_s24 }
  0x5a   : > { %380 = vmatpush1.bf16.msra.mxu0 %v632_v9  ;;  %p723_p7 = pneg %p722_p11 }
  0x5b   : > { %381 = vmatprep.subr.bf16.mxu0 %v633_v10  ;;  %p729_p13 = por %p728_p2, %p727_p10 }
  0x5d   : > { %p730_p0 = pnand %p729_p13, %p723_p7 }
  0x5e   : > { %382 = vmatpush1.bf16.msra.mxu0 %v635_v11 }
  0x5f   : > { %383 = vmatprep.subr.bf16.mxu0 %v636_v12 }
  0x62   : > { %384 = vmatpush1.bf16.msra.mxu0 %v638_v15 }
  0x63   : > { %385 = vmatprep.subr.bf16.mxu0 %v639_v16 }
  0x66   : > { %386 = vmatpush1.bf16.msra.mxu0 %v641_v17 }
  0x67   : > { %387 = vmatprep.subr.bf16.mxu0 %v642_v18 }
  0x6a   : > { %388 = vmatpush2.bf16.msra.mxu0 %v644_v19 }
  0x6b   : > { %389 = vmatprep.subr.bf16.mxu0 %v645_v20 }
  0x6e   : > { %390 = vmatpush2.bf16.msra.mxu0 %v647_v21 }
  0x6f   : > { %391 = vmatprep.subr.bf16.mxu0 %v648_v22 }
  0x72   : > { %392 = vmatpush2.bf16.msra.mxu0 %v650_v23 }
  0x73   : > { %393 = vmatprep.subr.bf16.mxu0 %v651_v24 }
  0x76   : > { %394 = vmatpush2.bf16.msra.mxu0 %v653_v25 }
  0x77   : > { %395 = vmatprep.subr.bf16.mxu0 %v654_v26 }
  0x7a   : > { %396 = vmatpush2.bf16.msra.mxu0 %v656_v27 }
  0x7b   : > { %397 = vmatprep.subr.bf16.mxu0 %v657_v28 }
  0x7e   : > { %398 = vmatpush2.bf16.msra.mxu0 %v659_v29 }
  0x7f   : > { %399 = vmatprep.subr.bf16.mxu0 %v660_v30 }
  0x82   : > { %400 = vmatpush2.bf16.msra.mxu0 %v662_v31 }
  0x83   : > { %401 = vmatprep.subr.bf16.mxu0 %v663_v32 }
  0x86   : > { %402 = vmatpush2.bf16.msra.mxu0 %v665_v33 }
  0x89   : > { %404 = vmatmul.mubr.bf16.vlgmr.msra.gmra.mxu0 %v177_v35 }
 0x149   : > { %v405_v36 = vpop.f32.mrf.mxu0 }
 0x14a   : > { %412 = vst [vmem:[%s174_s15] sm:$0xff] %v405_v36 }
 0x14b   : > { %v407_v37 = vpop.f32.mrf.mxu0 }
 0x14c   : > { %413 = vst [vmem:[%s174_s15 + $0x8] sm:$0xff] %v407_v37 }
 0x14d   : > { %v409_v38 = vpop.f32.mrf.mxu0 }
 0x14e   : > { %733 = shalt.err (!%p730_p0)
}
 0x14f   : > { %s734_s27 = scalar_lea.hbm %s943_s20, 256  ;;  %s738_s4 = scalar_lea.hbm %s986_s2, 512 }
 0x150   : > { %p735_p5 = scmp.ne.s32.totalorder %s943_s20, %s734_s27  ;;  %p739_p1 = scmp.lt.s32.totalorder %s943_s20, %s986_s2 }
 0x151   : > { %p740_p4 = scmp.lt.s32.totalorder %s738_s4, %s734_s27 }
 0x152   : > { %p736_p9 = pnand %p735_p5, %p1002_p3 }
 0x153   : > { %p741_p6 = por %p740_p4, %p739_p1 }
 0x154   : > { %p737_p12 = pneg %p736_p9 }
 0x156   : > { %p742_p8 = pnand %p741_p6, %p737_p12 }
 0x158   : > { %745 = shalt.err (!%p742_p8)
}
 0x159   : > { %565 = dma.vmem_to_hbm [thread:$0]  (%p1002_p3), %s938_s17, 256, %s943_s20, %s415_s23   ;;  %v410_v39 = vpop.f32.mrf.mxu0 }
 0x15a PF: > { %s441_s7 = sand.u32 1, %s776_s9   ;;  %p1003_p11 = scmp.ne.s32.totalorder %s992_s16, 0 }
 0x15b   : > { %p1004_p7 = scmp.ge.s32.totalorder %s788_s12, 2  ;;  %s442_s14 = scalar_lea.sflag [#allocation4], %s441_s7 }
 0x15d   : > { %p576_p10 = pnand %p1004_p7, %p1003_p11 }
 0x15f   : > { %p577_p2 = pneg %p576_p10 }
 0x161   : > { %771 = dma.done.wait (%p577_p2), %s442_s14, 256  }
 0x162   : > { %773 = vsyncadd (%p577_p2), %s442_s14, 4294967040  ;;  %p16_p13 = scmp.ge.s32.totalorder %s864_s21, 4   ;;  %s1005_s9 = smov %s780_s10 }
 0x163   : > { %s1006_s10 = smov %s784_s11  ;;  %s1007_s11 = smov %s881_s29 }
 0x164   : > { %s1008_s12 = smov %s864_s21  ;;  %18 = sbr.rel (!%p16_p13) target bundleno = 6 (0x6), region = 77 }
 0x169   :  { %447 = vsyncpa [#allocation3], 1 }
 0x16a   :  { %449 = vsyncpa [#allocation3 + $0x1], 1 }
 0x16b   :  { %450 = vsyncpa [#allocation6], 1 }
 0x16c   :  { %451 = vsyncpa [#allocation4], 1 }
 0x16d   :  { %453 = vsyncpa [#allocation4 + $0x1], 1 }

</bundles_post_ra>
